<compile_context>
chip_gen: v5e
topology: v5e:2x2
jax: 0.10.0
libtpu: 0.0.40
codegen_flags: <defaults>
</compile_context>

<pallas_src>
import functools

import jax
import jax.numpy as jnp
from jax.experimental import pallas as pl
from jax.experimental.pallas import tpu as pltpu

HIDDEN = 128
OUT_PAD = 128  # last-layer matmul width inside the kernel (one MXU lane group)


def _encoder_kernel(x_ref, w1_ref, b1_ref, w2_ref, b2_ref, w3_ref, b3_ref,
                    ot_ref, *, output_dim):
    # Cast the f32 input tile to bf16 in-kernel (VPU work hidden under MXU).
    x = x_ref[...].astype(jnp.bfloat16)
    # Layer 1: (tm, d_in)bf16 @ (d_in, 128)bf16 -> f32 acc, +bias, relu
    h = jnp.dot(x, w1_ref[...], preferred_element_type=jnp.float32)
    h = jnp.maximum(h + b1_ref[...], 0.0)
    # Layer 2: (tm, 128)bf16 @ (128, 128)bf16 -> f32 acc, +bias, relu
    h = jnp.dot(h.astype(jnp.bfloat16), w2_ref[...],
                preferred_element_type=jnp.float32)
    h = jnp.maximum(h + b2_ref[...], 0.0)
    # Layer 3: lane-padded matmul (only `output_dim` of 128 columns are real).
    # TODO(synk): if profiling shows the kernel is MXU-slot-bound, replace
    # this padded matmul with 2 VPU-multiply + XLU lane-reduce columns.
    h = jnp.dot(h.astype(jnp.bfloat16), w3_ref[...],
                preferred_element_type=jnp.float32)
    h = jnp.maximum(h + b3_ref[...], 0.0)
    # Lane-dense store: XLU-transpose (tm, 128) -> (128, tm), keep the real
    # output rows; the stored last dim is tm (>= 128 lanes, unmasked vst).
    ht = jnp.transpose(h)
    ot_ref[...] = ht[:output_dim, :].astype(ot_ref.dtype)


def prepare_params(w1, b1, w2, b2, w3, b3, *, output_dim=2):
    """One-time packing: bf16 weights, f32 (1, out) biases, W3/b3 lane-padded.

    Weights are (in_features, out_features), i.e. already transposed vs. torch.
    """
    assert output_dim <= OUT_PAD
    w3p = jnp.zeros((HIDDEN, OUT_PAD), jnp.float32).at[:, :output_dim].set(w3)
    b3p = jnp.zeros((1, OUT_PAD), jnp.float32).at[:, :output_dim].set(b3)
    return (w1.astype(jnp.bfloat16), b1.astype(jnp.float32),
            w2.astype(jnp.bfloat16), b2.astype(jnp.float32),
            w3p.astype(jnp.bfloat16), b3p.astype(jnp.float32))


def _round_up(x, m):
    return ((x + m - 1) // m) * m


def _pick_tm(n, d_in):
    """Row-tile heuristic (n, d_in are Python ints at trace time)."""
    if n <= 256:
        tm = _round_up(max(n, 1), 128)        # single grid step
    elif n < 4096:
        tm = _round_up(pl.cdiv(n, 2), 256)    # 2 balanced steps (v7x: 2 TCs)
    else:
        tm = 2048                             # amortize per-step overhead
    # Cap so the double-buffered f32 x tile stays <= ~16 MiB (v5e friendly).
    cap = max(128, ((2 * 1024 * 1024) // max(d_in, 1)) // 128 * 128)
    return min(tm, cap)


@functools.partial(jax.jit, static_argnames=("output_dim",))
def encoder_forward(x, w1, b1, w2, b2, w3p, b3p, *, output_dim=2):
    """x: (N, input_dim) float32. Params as produced by prepare_params()."""
    n, d_in = x.shape
    tm = _pick_tm(n, d_in)
    grid = (pl.cdiv(n, tm),)

    out_t = pl.pallas_call(
        functools.partial(_encoder_kernel, output_dim=output_dim),
        # Transposed output: (output_dim, n).  Last input/output blocks may be
        # partial; OOB input rows are garbage but their output lanes are
        # dropped on store (rows never mix across the feature contractions).
        out_shape=jax.ShapeDtypeStruct((output_dim, n), jnp.float32),
        grid_spec=pltpu.PrefetchScalarGridSpec(
            num_scalar_prefetch=0,
            grid=grid,
            in_specs=[
                pl.BlockSpec((tm, d_in), lambda i: (i, 0)),          # x tile
                pl.BlockSpec((d_in, HIDDEN), lambda i: (0, 0)),      # W1
                pl.BlockSpec((1, HIDDEN), lambda i: (0, 0)),         # b1
                pl.BlockSpec((HIDDEN, HIDDEN), lambda i: (0, 0)),    # W2
                pl.BlockSpec((1, HIDDEN), lambda i: (0, 0)),         # b2
                pl.BlockSpec((HIDDEN, OUT_PAD), lambda i: (0, 0)),   # W3 (pad)
                pl.BlockSpec((1, OUT_PAD), lambda i: (0, 0)),        # b3 (pad)
            ],
            # Lane-dense transposed output block: last dim = tm (>= 128).
            out_specs=pl.BlockSpec((output_dim, tm), lambda i: (0, i)),
        ),
        compiler_params=pltpu.CompilerParams(
            dimension_semantics=("parallel",),
            vmem_limit_bytes=64 << 20,
        ),
    )(x, w1, b1, w2, b2, w3p, b3p)

    # Tiny (output_dim, n) -> (n, output_dim) transpose; negligible HBM traffic
    # compared with the x read.
    return out_t.T


def _init_linear(key, fan_in, fan_out):
    """nn.Linear default init: U(-1/sqrt(fan_in), 1/sqrt(fan_in))."""
    kw, kb = jax.random.split(key)
    bound = 1.0 / jnp.sqrt(jnp.float32(fan_in))
    w = jax.random.uniform(kw, (fan_in, fan_out), jnp.float32, -bound, bound)
    b = jax.random.uniform(kb, (1, fan_out), jnp.float32, -bound, bound)
    return w, b


def _ref_forward_bf16(x, w1, b1, w2, b2, w3, b3):
    """Pure-JAX reference replicating the kernel's bf16-operand / f32-acc math."""
    h = jnp.dot(x.astype(jnp.bfloat16), w1.astype(jnp.bfloat16),
                preferred_element_type=jnp.float32)
    h = jnp.maximum(h + b1, 0.0)
    h = jnp.dot(h.astype(jnp.bfloat16), w2.astype(jnp.bfloat16),
                preferred_element_type=jnp.float32)
    h = jnp.maximum(h + b2, 0.0)
    h = jnp.dot(h.astype(jnp.bfloat16), w3.astype(jnp.bfloat16),
                preferred_element_type=jnp.float32)
    h = jnp.maximum(h + b3, 0.0)
    return h


if __name__ == "__main__":
    key = jax.random.PRNGKey(0)
    k_x, k1, k2, k3, k_x2 = jax.random.split(key, 5)

    input_dim = 32
    output_dim = 2

    w1, b1 = _init_linear(k1, input_dim, HIDDEN)
    w2, b2 = _init_linear(k2, HIDDEN, HIDDEN)
    w3, b3 = _init_linear(k3, HIDDEN, output_dim)
    params = prepare_params(w1, b1, w2, b2, w3, b3, output_dim=output_dim)

    # Case 1: small batch, single (partial) grid step.
    n1 = 64
    x1 = jax.random.normal(k_x, (n1, input_dim), jnp.float32)
    y1 = encoder_forward(x1, *params, output_dim=output_dim)
    jax.block_until_ready(y1)
    ref1 = _ref_forward_bf16(x1, w1, b1, w2, b2, w3, b3)
    assert y1.shape == (n1, output_dim)
    assert jnp.allclose(y1, ref1, atol=1e-2, rtol=1e-2)

    # Case 2: ragged batch, 2 grid steps with a partial last block.
    n2 = 300
    x2 = jax.random.normal(k_x2, (n2, input_dim), jnp.float32)
    y2 = encoder_forward(x2, *params, output_dim=output_dim)
    jax.block_until_ready(y2)
    ref2 = _ref_forward_bf16(x2, w1, b1, w2, b2, w3, b3)
    assert y2.shape == (n2, output_dim)
    assert jnp.allclose(y2, ref2, atol=1e-2, rtol=1e-2)

    print("KERNEL_OK")
</pallas_src>

<mosaic_0001>
module attributes {stable_mosaic.version = 11 : i64} {
  func.func @_encoder_kernel(%arg0: i32, %arg1: memref<128x32xf32, #tpu.memory_space<vmem>>, %arg2: memref<32x128xbf16, #tpu.memory_space<vmem>>, %arg3: memref<1x128xf32, #tpu.memory_space<vmem>>, %arg4: memref<128x128xbf16, #tpu.memory_space<vmem>>, %arg5: memref<1x128xf32, #tpu.memory_space<vmem>>, %arg6: memref<128x128xbf16, #tpu.memory_space<vmem>>, %arg7: memref<1x128xf32, #tpu.memory_space<vmem>>, %arg8: memref<2x128xf32, #tpu.memory_space<vmem>>) attributes {dimension_semantics = [#tpu.dimension_semantics<parallel>], iteration_bounds = array<i64: 1>, scalar_prefetch = 0 : i64, scratch_operands = 0 : i64, tpu.core_type = #tpu.core_type<tc>, window_params = [{transform_indices = @transform_0, window_bounds = array<i64: 128, 32>}, {pipeline_mode = #tpu.pipeline_mode<synchronous>, transform_indices = @transform_1, window_bounds = array<i64: 32, 128>}, {pipeline_mode = #tpu.pipeline_mode<synchronous>, transform_indices = @transform_2, window_bounds = array<i64: 1, 128>}, {pipeline_mode = #tpu.pipeline_mode<synchronous>, transform_indices = @transform_3, window_bounds = array<i64: 128, 128>}, {pipeline_mode = #tpu.pipeline_mode<synchronous>, transform_indices = @transform_4, window_bounds = array<i64: 1, 128>}, {pipeline_mode = #tpu.pipeline_mode<synchronous>, transform_indices = @transform_5, window_bounds = array<i64: 128, 128>}, {pipeline_mode = #tpu.pipeline_mode<synchronous>, transform_indices = @transform_6, window_bounds = array<i64: 1, 128>}, {transform_indices = @transform_7, window_bounds = array<i64: 2, 128>}]} {
    %c0 = arith.constant 0 : index
    %c0_0 = arith.constant 0 : index
    %0 = vector.load %arg1[%c0, %c0_0] : memref<128x32xf32, #tpu.memory_space<vmem>>, vector<128x32xf32>
    %1 = arith.truncf %0 : vector<128x32xf32> to vector<128x32xbf16>
    %c0_1 = arith.constant 0 : index
    %c0_2 = arith.constant 0 : index
    %2 = vector.load %arg2[%c0_1, %c0_2] : memref<32x128xbf16, #tpu.memory_space<vmem>>, vector<32x128xbf16>
    %cst = arith.constant dense<0.000000e+00> : vector<128x128xf32>
    %3 = tpu.matmul %1, %2, %cst {dimension_numbers = #tpu.dot_dimension_numbers<[1], [0], [0], [1], [0, 0, 1, 1], [], []>} : vector<128x32xbf16>, vector<32x128xbf16>, vector<128x128xf32> -> vector<128x128xf32>
    %c0_3 = arith.constant 0 : index
    %c0_4 = arith.constant 0 : index
    %4 = vector.load %arg3[%c0_3, %c0_4] : memref<1x128xf32, #tpu.memory_space<vmem>>, vector<1x128xf32>
    %5 = vector.broadcast %4 : vector<1x128xf32> to vector<128x128xf32>
    %6 = arith.addf %3, %5 : vector<128x128xf32>
    %cst_5 = arith.constant 0.000000e+00 : f32
    %7 = vector.broadcast %cst_5 : f32 to vector<128x128xf32>
    %8 = arith.maximumf %6, %7 : vector<128x128xf32>
    %9 = arith.truncf %8 : vector<128x128xf32> to vector<128x128xbf16>
    %c0_6 = arith.constant 0 : index
    %c0_7 = arith.constant 0 : index
    %10 = vector.load %arg4[%c0_6, %c0_7] : memref<128x128xbf16, #tpu.memory_space<vmem>>, vector<128x128xbf16>
    %cst_8 = arith.constant dense<0.000000e+00> : vector<128x128xf32>
    %11 = tpu.matmul %9, %10, %cst_8 {dimension_numbers = #tpu.dot_dimension_numbers<[1], [0], [0], [1], [0, 0, 1, 1], [], []>} : vector<128x128xbf16>, vector<128x128xbf16>, vector<128x128xf32> -> vector<128x128xf32>
    %c0_9 = arith.constant 0 : index
    %c0_10 = arith.constant 0 : index
    %12 = vector.load %arg5[%c0_9, %c0_10] : memref<1x128xf32, #tpu.memory_space<vmem>>, vector<1x128xf32>
    %13 = vector.broadcast %12 : vector<1x128xf32> to vector<128x128xf32>
    %14 = arith.addf %11, %13 : vector<128x128xf32>
    %cst_11 = arith.constant 0.000000e+00 : f32
    %15 = vector.broadcast %cst_11 : f32 to vector<128x128xf32>
    %16 = arith.maximumf %14, %15 : vector<128x128xf32>
    %17 = arith.truncf %16 : vector<128x128xf32> to vector<128x128xbf16>
    %c0_12 = arith.constant 0 : index
    %c0_13 = arith.constant 0 : index
    %18 = vector.load %arg6[%c0_12, %c0_13] : memref<128x128xbf16, #tpu.memory_space<vmem>>, vector<128x128xbf16>
    %cst_14 = arith.constant dense<0.000000e+00> : vector<128x128xf32>
    %19 = tpu.matmul %17, %18, %cst_14 {dimension_numbers = #tpu.dot_dimension_numbers<[1], [0], [0], [1], [0, 0, 1, 1], [], []>} : vector<128x128xbf16>, vector<128x128xbf16>, vector<128x128xf32> -> vector<128x128xf32>
    %c0_15 = arith.constant 0 : index
    %c0_16 = arith.constant 0 : index
    %20 = vector.load %arg7[%c0_15, %c0_16] : memref<1x128xf32, #tpu.memory_space<vmem>>, vector<1x128xf32>
    %21 = vector.broadcast %20 : vector<1x128xf32> to vector<128x128xf32>
    %22 = arith.addf %19, %21 : vector<128x128xf32>
    %cst_17 = arith.constant 0.000000e+00 : f32
    %23 = vector.broadcast %cst_17 : f32 to vector<128x128xf32>
    %24 = arith.maximumf %22, %23 : vector<128x128xf32>
    %25 = tpu.transpose %24, [1, 0] : vector<128x128xf32> -> vector<128x128xf32>
    %26 = vector.extract_strided_slice %25 {offsets = [0, 0], sizes = [2, 128], strides = [1, 1]} : vector<128x128xf32> to vector<2x128xf32>
    %c0_18 = arith.constant 0 : index
    %c0_19 = arith.constant 0 : index
    %27 = vector.load %arg8[%c0_18, %c0_19] : memref<2x128xf32, #tpu.memory_space<vmem>>, vector<2x128xf32>
    tpu.vector_store %arg8[%c0_18, %c0_19], %26 {strides = array<i32>} : memref<2x128xf32, #tpu.memory_space<vmem>>, vector<2x128xf32>,
    return
  }
  func.func @transform_0(%arg0: i32) -> (i32, i32) {
    %c0_i32 = arith.constant 0 : i32
    %c0_i32_0 = arith.constant 0 : i32
    return %arg0, %c0_i32 : i32, i32
  }
  func.func @transform_1(%arg0: i32) -> (i32, i32) {
    %c0_i32 = arith.constant 0 : i32
    %c0_i32_0 = arith.constant 0 : i32
    %c0_i32_1 = arith.constant 0 : i32
    return %c0_i32, %c0_i32_0 : i32, i32
  }
  func.func @transform_2(%arg0: i32) -> (i32, i32) {
    %c0_i32 = arith.constant 0 : i32
    %c0_i32_0 = arith.constant 0 : i32
    %c0_i32_1 = arith.constant 0 : i32
    return %c0_i32, %c0_i32_0 : i32, i32
  }
  func.func @transform_3(%arg0: i32) -> (i32, i32) {
    %c0_i32 = arith.constant 0 : i32
    %c0_i32_0 = arith.constant 0 : i32
    %c0_i32_1 = arith.constant 0 : i32
    return %c0_i32, %c0_i32_0 : i32, i32
  }
  func.func @transform_4(%arg0: i32) -> (i32, i32) {
    %c0_i32 = arith.constant 0 : i32
    %c0_i32_0 = arith.constant 0 : i32
    %c0_i32_1 = arith.constant 0 : i32
    return %c0_i32, %c0_i32_0 : i32, i32
  }
  func.func @transform_5(%arg0: i32) -> (i32, i32) {
    %c0_i32 = arith.constant 0 : i32
    %c0_i32_0 = arith.constant 0 : i32
    %c0_i32_1 = arith.constant 0 : i32
    return %c0_i32, %c0_i32_0 : i32, i32
  }
  func.func @transform_6(%arg0: i32) -> (i32, i32) {
    %c0_i32 = arith.constant 0 : i32
    %c0_i32_0 = arith.constant 0 : i32
    %c0_i32_1 = arith.constant 0 : i32
    return %c0_i32, %c0_i32_0 : i32, i32
  }
  func.func @transform_7(%arg0: i32) -> (i32, i32) {
    %c0_i32 = arith.constant 0 : i32
    %c0_i32_0 = arith.constant 0 : i32
    return %c0_i32, %arg0 : i32, i32
  }
}

</mosaic_0001>

<bundles_post_ra>
// kernel: encoder_forward.1
= control target key start
LH: loop header
LB: loop body
LE: loop exit
PB: predicated region body
PF: predicated region fallthrough
CT: control target
= control target key end

     0   :  { %12 = vsyncpa [#allocation3], 0  ;;  %s846_s0 = inlined_call_operand.vmem [shape: f32[64,32], index: 0, kind: input, shape index: {}]   ;;  %s847_s1 = inlined_call_operand.vmem [shape: bf16[32,128], index: 1, kind: input, shape index: {}]   ;;  %s848_s2 = inlined_call_operand.vmem [shape: f32[1,128], index: 2, kind: input, shape index: {}]   ;;  %s849_s3 = inlined_call_operand.vmem [shape: bf16[128,128], index: 3, kind: input, shape index: {}]   ;;  %s850_s4 = inlined_call_operand.vmem [shape: f32[1,128], index: 4, kind: input, shape index: {}]   ;;  %s851_s5 = inlined_call_operand.hbm [shape: bf16[128,128], index: 5, kind: input, shape index: {}]   ;;  %s852_s6 = inlined_call_operand.vmem [shape: f32[1,128], index: 6, kind: input, shape index: {}]   ;;  %s853_s7 = inlined_call_operand.hbm [shape: f32[2,64], index: 7, kind: output, shape index: {}]  }
   0x1   :  { %13 = vsyncpa [#allocation4], 0  ;;  %s28_s26 = sshll.u32 %s851_s5, 4  ;;  %s683_s27 = smov [#allocation2]   ;;  %s29_s26 = int_to_ptr.hbm [resolvable:$true] %s28_s26 }
   0x2   :  { %s30_s28 = sshll.u32 %s683_s27, 4  ;;  %s684_s29 = smov 64   ;;  %s31_s28 = int_to_ptr.vmem [resolvable:$true] %s30_s28 }
   0x3   :  { %s685_s30 = smov 4  }
   0x4   :  { %36 = dma.hbm_to_vmem [thread:$0]  %s29_s26, 1024, %s31_s28, [#allocation3], %s684_s29, %s684_s29, %s685_s30  }
   0x5   :  { %679 = dma.done.wait [#allocation3], 1024  }
   0x6   :  { %680 = vsyncadd [#allocation3], 4294966272  ;;  %v591_v0 = vld [vmem:[%s847_s1 + $0x8] sm:$0xff]  ;;  %v590_v1 = vld [vmem:[%s847_s1] sm:$0xff]  ;;  %vm88_vm0 = vcmask 261120   ;;  %s500_s14 = sshll.u32 %s853_s7, 4  ;;  %s501_s14 = int_to_ptr.hbm [resolvable:$true] %s500_s14 }
   0x7   :  { %119 = vmatpush.bf16.msra.mxu0 %v591_v0  ;;  %v44_v2 = vld [vmem:[%s846_s0] sm:$0xff]  ;;  %v45_v3 = vld [vmem:[%s846_s0 + $0x8] sm:$0xff]  ;;  %v46_v5 = vld [vmem:[%s846_s0 + $0x10] sm:$0xff] }
   0x8   :  { %v60_v4 = vpack.c.bf16 %v45_v3, %v44_v2  ;;  %v47_v6 = vld [vmem:[%s846_s0 + $0x18] sm:$0xff]  ;;  %v48_v8 = vld [vmem:[%s846_s0 + $0x20] sm:$0xff]  ;;  %v49_v9 = vld [vmem:[%s846_s0 + $0x28] sm:$0xff] }
   0x9   :  { %v61_v7 = vpack.c.bf16 %v47_v6, %v46_v5  ;;  %v62_v10 = vpack.c.bf16 %v49_v9, %v48_v8  ;;  %v50_v11 = vld [vmem:[%s846_s0 + $0x30] sm:$0xff]  ;;  %v51_v12 = vld [vmem:[%s846_s0 + $0x38] sm:$0xff]  ;;  %v52_v14 = vld [vmem:[%s846_s0 + $0x40] sm:$0xff] }
   0xa   :  { %v63_v13 = vpack.c.bf16 %v51_v12, %v50_v11  ;;  %v53_v15 = vld [vmem:[%s846_s0 + $0x48] sm:$0xff]  ;;  %v599_v17 = vld [vmem:[%s849_s3 + $0x38] sm:$0xff]  ;;  %v54_v18 = vld [vmem:[%s846_s0 + $0x50] sm:$0xff] }
   0xb   :  { %120 = vmatpush.bf16.msra.mxu0 %v590_v1  ;;  %v64_v16 = vpack.c.bf16 %v53_v15, %v52_v14  ;;  %254 = vmatpush.bf16.msra.mxu1 %v599_v17  ;;  %v55_v19 = vld [vmem:[%s846_s0 + $0x58] sm:$0xff]  ;;  %v598_v21 = vld [vmem:[%s849_s3 + $0x30] sm:$0xff]  ;;  %v597_v22 = vld [vmem:[%s849_s3 + $0x28] sm:$0xff] }
   0xc   :  { %608 = vmatpush.bf16.msra.mxu3 %v599_v17  ;;  %v65_v20 = vpack.c.bf16 %v55_v19, %v54_v18  ;;  %v596_v23 = vld [vmem:[%s849_s3 + $0x20] sm:$0xff]  ;;  %v57_v25 = vld [vmem:[%s846_s0 + $0x68] sm:$0xff]  ;;  %v595_v26 = vld [vmem:[%s849_s3 + $0x18] sm:$0xff] }
   0xd   :  { %v56_v24 = vld [vmem:[%s846_s0 + $0x60] sm:$0xff]  ;;  %v594_v28 = vld [vmem:[%s849_s3 + $0x10] sm:$0xff]  ;;  %v593_v29 = vld [vmem:[%s849_s3 + $0x8] sm:$0xff] }
   0xe   :  { %518 = vmatmul.msk.bf16.vlgmr.msra.gmra.mxu0 %vm88_vm0, %v60_v4  ;;  %v66_v27 = vpack.c.bf16 %v57_v25, %v56_v24  ;;  %v592_v30 = vld [vmem:[%s849_s3] sm:$0xff]  ;;  %v58_v31 = vld [vmem:[%s846_s0 + $0x70] sm:$0xff]  ;;  %v59_v32 = vld [vmem:[%s846_s0 + $0x78] sm:$0xff] }
   0xf   :  { %255 = vmatpush.bf16.msra.mxu1 %v598_v21  ;;  %v67_v33 = vpack.c.bf16 %v59_v32, %v58_v31  ;;  %v819_v35 = vld [vmem:[%s848_s2] ss:$0 sm:$0xff]  ;;  %v606_v14 = vld [vmem:[#allocation2 + $0x30] sm:$0xff] }
  0x10   :  { %609 = vmatpush.bf16.msra.mxu3 %v598_v21  ;;  %v604_v17 = vld [vmem:[#allocation2 + $0x20] sm:$0xff]  ;;  %v603_v21 = vld [vmem:[#allocation2 + $0x18] sm:$0xff]  ;;  %v602_v25 = vld [vmem:[#allocation2 + $0x10] sm:$0xff] }
  0x13   :  { %256 = vmatpush.bf16.msra.mxu1 %v597_v22 }
  0x14   :  { %610 = vmatpush.bf16.msra.mxu3 %v597_v22 }
  0x17   :  { %257 = vmatpush.bf16.msra.mxu1 %v596_v23 }
  0x18   :  { %611 = vmatpush.bf16.msra.mxu3 %v596_v23 }
  0x1b   :  { %258 = vmatpush.bf16.msra.mxu1 %v595_v26 }
  0x1c   :  { %612 = vmatpush.bf16.msra.mxu3 %v595_v26 }
  0x1e   :  { %519 = vmatmul.msk.bf16.gmra.mxu0 %vm88_vm0, %v61_v7 }
  0x1f   :  { %259 = vmatpush.bf16.msra.mxu1 %v594_v28 }
  0x20   :  { %613 = vmatpush.bf16.msra.mxu3 %v594_v28  ;;  %v600_v28 = vld [vmem:[#allocation2] sm:$0xff] }
  0x23   :  { %260 = vmatpush.bf16.msra.mxu1 %v593_v29 }
  0x24   :  { %614 = vmatpush.bf16.msra.mxu3 %v593_v29 }
  0x27   :  { %261 = vmatpush.bf16.msra.mxu1 %v592_v30 }
  0x28   :  { %615 = vmatpush.bf16.msra.mxu3 %v592_v30 }
  0x2e   :  { %520 = vmatmul.msk.bf16.gmra.mxu0 %vm88_vm0, %v62_v10  ;;  %v607_v10 = vld [vmem:[#allocation2 + $0x38] sm:$0xff] }
  0x2f   :  { %395 = vmatpush.bf16.msra.mxu2 %v607_v10  ;;  %616 = vmatpush.bf16.msrb.mxu3 %v607_v10 }
  0x33   :  { %396 = vmatpush.bf16.msra.mxu2 %v606_v14  ;;  %617 = vmatpush.bf16.msrb.mxu3 %v606_v14 }
  0x3e   :  { %521 = vmatmul.msk.bf16.gmra.mxu0 %vm88_vm0, %v63_v13 }
  0x4e   :  { %522 = vmatmul.msk.bf16.gmra.mxu0 %vm88_vm0, %v64_v16  ;;  %v605_v16 = vld [vmem:[#allocation2 + $0x28] sm:$0xff] }
  0x4f   :  { %397 = vmatpush.bf16.msra.mxu2 %v605_v16  ;;  %618 = vmatpush.bf16.msrb.mxu3 %v605_v16 }
  0x53   :  { %398 = vmatpush.bf16.msra.mxu2 %v604_v17  ;;  %619 = vmatpush.bf16.msrb.mxu3 %v604_v17 }
  0x57   :  { %399 = vmatpush.bf16.msra.mxu2 %v603_v21  ;;  %620 = vmatpush.bf16.msrb.mxu3 %v603_v21 }
  0x5b   :  { %400 = vmatpush.bf16.msra.mxu2 %v602_v25  ;;  %621 = vmatpush.bf16.msrb.mxu3 %v602_v25 }
  0x5e   :  { %523 = vmatmul.msk.bf16.gmra.mxu0 %vm88_vm0, %v65_v20 }
  0x6e   :  { %524 = vmatmul.msk.bf16.gmra.mxu0 %vm88_vm0, %v66_v27  ;;  %v601_v27 = vld [vmem:[#allocation2 + $0x8] sm:$0xff] }
  0x6f   :  { %401 = vmatpush.bf16.msra.mxu2 %v601_v27  ;;  %622 = vmatpush.bf16.msrb.mxu3 %v601_v27 }
  0x73   :  { %402 = vmatpush.bf16.msra.mxu2 %v600_v28  ;;  %623 = vmatpush.bf16.msrb.mxu3 %v600_v28  ;;  %v630_v28 = vld [vmem:[%s852_s6] ss:$0 sm:$0xff]  ;;  %s686_s6 = smov [#allocation5]  }
  0x74   :  { %s498_s12 = sshll.u32 %s686_s6, 4  ;;  %s499_s12 = int_to_ptr.vmem [resolvable:$true] %s498_s12 }
  0x7e   :  { %525 = vmatmul.msk.bf16.gmra.mxu0 %vm88_vm0, %v67_v33 }
  0x8b   :  { %v122_v34 = vpop.f32.mrf.mxu0 }
  0x8c   :  { %v123_v36 = vadd.f32 %v819_v35, %v122_v34 }
  0x8e   :  { %v162_v39 = vmax.f32 %v123_v36, 0.0 }
  0x93   :  { %v124_v37 = vpop.f32.mrf.mxu0 }
  0x94   :  { %v125_v38 = vadd.f32 %v819_v35, %v124_v37  ;;  %v629_v37 = vld [vmem:[%s850_s4] ss:$0 sm:$0xff] }
  0x96   :  { %v163_v40 = vmax.f32 %v125_v38, 0.0 }
  0x98   :  { %v178_v41 = vpack.c.bf16 %v163_v40, %v162_v39 }
  0x9a   :  { %262 = vmatmul.bf16.vlgmr.msra.gmra.mxu1 %v178_v41 }
  0x9b   :  { %v127_v42 = vpop.f32.mrf.mxu0 }
  0x9c   :  { %v128_v43 = vadd.f32 %v819_v35, %v127_v42 }
  0x9e   :  { %v164_v46 = vmax.f32 %v128_v43, 0.0 }
  0xa3   :  { %v129_v44 = vpop.f32.mrf.mxu0 }
  0xa4   :  { %v130_v45 = vadd.f32 %v819_v35, %v129_v44 }
  0xa6   :  { %v165_v47 = vmax.f32 %v130_v45, 0.0 }
  0xa8   :  { %v179_v48 = vpack.c.bf16 %v165_v47, %v164_v46 }
  0xaa   :  { %267 = vmatmul.bf16.gmra.mxu1 %v179_v48 }
  0xab   :  { %v132_v49 = vpop.f32.mrf.mxu0 }
  0xac   :  { %v133_v50 = vadd.f32 %v819_v35, %v132_v49 }
  0xae   :  { %v166_v53 = vmax.f32 %v133_v50, 0.0 }
  0xb3   :  { %v134_v51 = vpop.f32.mrf.mxu0 }
  0xb4   :  { %v135_v52 = vadd.f32 %v819_v35, %v134_v51 }
  0xb6   :  { %v167_v54 = vmax.f32 %v135_v52, 0.0 }
  0xb8   :  { %v180_v55 = vpack.c.bf16 %v167_v54, %v166_v53 }
  0xba   :  { %272 = vmatmul.bf16.gmra.mxu1 %v180_v55 }
  0xbb   :  { %v137_v56 = vpop.f32.mrf.mxu0 }
  0xbc   :  { %v138_v57 = vadd.f32 %v819_v35, %v137_v56 }
  0xbe   :  { %v168_v60 = vmax.f32 %v138_v57, 0.0 }
  0xc3   :  { %v139_v58 = vpop.f32.mrf.mxu0 }
  0xc4   :  { %v140_v59 = vadd.f32 %v819_v35, %v139_v58 }
  0xc6   :  { %v169_v61 = vmax.f32 %v140_v59, 0.0 }
  0xc8   :  { %v181_v62 = vpack.c.bf16 %v169_v61, %v168_v60 }
  0xca   :  { %277 = vmatmul.bf16.gmra.mxu1 %v181_v62 }
  0xcb   :  { %v142_v63 = vpop.f32.mrf.mxu0 }
  0xcc   :  { %v143_v0 = vadd.f32 %v819_v35, %v142_v63 }
  0xce   :  { %v170_v3 = vmax.f32 %v143_v0, 0.0 }
  0xd3   :  { %v144_v1 = vpop.f32.mrf.mxu0 }
  0xd4   :  { %v145_v2 = vadd.f32 %v819_v35, %v144_v1 }
  0xd6   :  { %v171_v4 = vmax.f32 %v145_v2, 0.0 }
  0xd8   :  { %v182_v5 = vpack.c.bf16 %v171_v4, %v170_v3 }
  0xda   :  { %282 = vmatmul.bf16.gmra.mxu1 %v182_v5 }
  0xdb   :  { %v147_v6 = vpop.f32.mrf.mxu0 }
  0xdc   :  { %v148_v7 = vadd.f32 %v819_v35, %v147_v6 }
  0xde   :  { %v172_v11 = vmax.f32 %v148_v7, 0.0 }
  0xe3   :  { %v149_v8 = vpop.f32.mrf.mxu0 }
  0xe4   :  { %v150_v9 = vadd.f32 %v819_v35, %v149_v8 }
  0xe6   :  { %v173_v12 = vmax.f32 %v150_v9, 0.0 }
  0xe8   :  { %v183_v13 = vpack.c.bf16 %v173_v12, %v172_v11 }
  0xea   :  { %287 = vmatmul.bf16.gmra.mxu1 %v183_v13 }
  0xeb   :  { %v152_v15 = vpop.f32.mrf.mxu0 }
  0xec   :  { %v153_v18 = vadd.f32 %v819_v35, %v152_v15 }
  0xee   :  { %v174_v22 = vmax.f32 %v153_v18, 0.0 }
  0xf3   :  { %v154_v19 = vpop.f32.mrf.mxu0 }
  0xf4   :  { %v155_v20 = vadd.f32 %v819_v35, %v154_v19 }
  0xf6   :  { %v175_v23 = vmax.f32 %v155_v20, 0.0 }
  0xf8   :  { %v184_v24 = vpack.c.bf16 %v175_v23, %v174_v22 }
  0xfa   :  { %292 = vmatmul.bf16.vlgmr.msra.gmra.mxu3 %v184_v24 }
  0xfb   :  { %v157_v26 = vpop.f32.mrf.mxu0 }
  0xfc   :  { %v158_v29 = vadd.f32 %v819_v35, %v157_v26 }
  0xfe   :  { %v176_v32 = vmax.f32 %v158_v29, 0.0 }
 0x103   :  { %v159_v30 = vpop.f32.mrf.mxu0 }
 0x104   :  { %v160_v31 = vadd.f32 %v819_v35, %v159_v30 }
 0x106   :  { %v177_v33 = vmax.f32 %v160_v31, 0.0 }
 0x108   :  { %v185_v34 = vpack.c.bf16 %v177_v33, %v176_v32 }
 0x10a   :  { %297 = vmatmul.bf16.gmra.mxu3 %v185_v34 }
 0x117   :  { %v263_v36 = vpop.f32.mrf.mxu1 }
 0x118   :  { %v264_v38 = vadd.f32 %v629_v37, %v263_v36 }
 0x11a   :  { %v303_v41 = vmax.f32 %v264_v38, 0.0 }
 0x11f   :  { %v265_v39 = vpop.f32.mrf.mxu1 }
 0x120   :  { %v266_v40 = vadd.f32 %v629_v37, %v265_v39 }
 0x122   :  { %v304_v42 = vmax.f32 %v266_v40, 0.0 }
 0x124   :  { %v319_v43 = vpack.c.bf16 %v304_v42, %v303_v41 }
 0x126   :  { %403 = vmatmul.bf16.vlgmr.msra.gmra.mxu2 %v319_v43 }
 0x127   :  { %v268_v44 = vpop.f32.mrf.mxu1 }
 0x128   :  { %v269_v45 = vadd.f32 %v629_v37, %v268_v44 }
 0x12a   :  { %v305_v47 = vmax.f32 %v269_v45, 0.0 }
 0x12f   :  { %v270_v46 = vpop.f32.mrf.mxu1 }
 0x130   :  { %v271_v35 = vadd.f32 %v629_v37, %v270_v46 }
 0x132   :  { %v306_v48 = vmax.f32 %v271_v35, 0.0 }
 0x134   :  { %v320_v49 = vpack.c.bf16 %v306_v48, %v305_v47 }
 0x136   :  { %408 = vmatmul.bf16.gmra.mxu2 %v320_v49 }
 0x137   :  { %v273_v50 = vpop.f32.mrf.mxu1 }
 0x138   :  { %v274_v51 = vadd.f32 %v629_v37, %v273_v50 }
 0x13a   :  { %v307_v54 = vmax.f32 %v274_v51, 0.0 }
 0x13f   :  { %v275_v52 = vpop.f32.mrf.mxu1 }
 0x140   :  { %v276_v53 = vadd.f32 %v629_v37, %v275_v52 }
 0x142   :  { %v308_v55 = vmax.f32 %v276_v53, 0.0 }
 0x144   :  { %v321_v56 = vpack.c.bf16 %v308_v55, %v307_v54 }
 0x146   :  { %413 = vmatmul.bf16.gmra.mxu2 %v321_v56 }
 0x147   :  { %v278_v57 = vpop.f32.mrf.mxu1 }
 0x148   :  { %v279_v58 = vadd.f32 %v629_v37, %v278_v57 }
 0x14a   :  { %v309_v61 = vmax.f32 %v279_v58, 0.0 }
 0x14f   :  { %v280_v59 = vpop.f32.mrf.mxu1 }
 0x150   :  { %v281_v60 = vadd.f32 %v629_v37, %v280_v59 }
 0x152   :  { %v310_v62 = vmax.f32 %v281_v60, 0.0 }
 0x154   :  { %v322_v63 = vpack.c.bf16 %v310_v62, %v309_v61 }
 0x156   :  { %418 = vmatmul.bf16.gmra.mxu2 %v322_v63 }
 0x157   :  { %v283_v0 = vpop.f32.mrf.mxu1 }
 0x158   :  { %v284_v1 = vadd.f32 %v629_v37, %v283_v0 }
 0x15a   :  { %v311_v4 = vmax.f32 %v284_v1, 0.0 }
 0x15f   :  { %v285_v2 = vpop.f32.mrf.mxu1 }
 0x160   :  { %v286_v3 = vadd.f32 %v629_v37, %v285_v2 }
 0x162   :  { %v312_v5 = vmax.f32 %v286_v3, 0.0 }
 0x164   :  { %v323_v6 = vpack.c.bf16 %v312_v5, %v311_v4 }
 0x166   :  { %423 = vmatmul.bf16.gmra.mxu2 %v323_v6 }
 0x167   :  { %v288_v7 = vpop.f32.mrf.mxu1 }
 0x168   :  { %v289_v8 = vadd.f32 %v629_v37, %v288_v7 }
 0x16a   :  { %v313_v11 = vmax.f32 %v289_v8, 0.0 }
 0x16f   :  { %v290_v9 = vpop.f32.mrf.mxu1 }
 0x170   :  { %v291_v10 = vadd.f32 %v629_v37, %v290_v9 }
 0x172   :  { %v314_v12 = vmax.f32 %v291_v10, 0.0 }
 0x174   :  { %v324_v13 = vpack.c.bf16 %v314_v12, %v313_v11 }
 0x176   :  { %428 = vmatmul.bf16.gmra.mxu2 %v324_v13 }
 0x17d   :  { %v293_v14 = vpop.f32.mrf.mxu3 }
 0x17e   :  { %v294_v15 = vadd.f32 %v629_v37, %v293_v14 }
 0x180   :  { %v315_v18 = vmax.f32 %v294_v15, 0.0 }
 0x185   :  { %v295_v16 = vpop.f32.mrf.mxu3 }
 0x186   :  { %v296_v17 = vadd.f32 %v629_v37, %v295_v16 }
 0x188   :  { %v316_v19 = vmax.f32 %v296_v17, 0.0 }
 0x18a   :  { %v325_v20 = vpack.c.bf16 %v316_v19, %v315_v18 }
 0x18c   :  { %433 = vmatmul.bf16.vlgmr.msrb.gmra.mxu3 %v325_v20 }
 0x18d   :  { %v298_v21 = vpop.f32.mrf.mxu3 }
 0x18e   :  { %v299_v22 = vadd.f32 %v629_v37, %v298_v21 }
 0x190   :  { %v317_v25 = vmax.f32 %v299_v22, 0.0 }
 0x195   :  { %v300_v23 = vpop.f32.mrf.mxu3 }
 0x196   :  { %v301_v24 = vadd.f32 %v629_v37, %v300_v23 }
 0x198   :  { %v318_v26 = vmax.f32 %v301_v24, 0.0 }
 0x19a   :  { %v326_v27 = vpack.c.bf16 %v318_v26, %v317_v25 }
 0x19c   :  { %438 = vmatmul.bf16.gmra.mxu3 %v326_v27 }
 0x1a9   :  { %v404_v29 = vpop.f32.mrf.mxu2 }
 0x1aa   :  { %v405_v30 = vadd.f32 %v630_v28, %v404_v29 }
 0x1ac   :  { %v444_v31 = vmax.f32 %v405_v30, 0.0 }
 0x1ae   :  { %460 = vxpose.xlu0.b32.start [1/16] (narrow) %v444_v31, 8 }
 0x1b1   :  { %v406_v32 = vpop.f32.mrf.mxu2 }
 0x1b2   :  { %v407_v33 = vadd.f32 %v630_v28, %v406_v32 }
 0x1b4   :  { %v445_v34 = vmax.f32 %v407_v33, 0.0 }
 0x1b6   :  { %461 = vxpose.xlu0.b32.cont [2/16] (narrow) %v445_v34, 8 }
 0x1b9   :  { %v409_v36 = vpop.f32.mrf.mxu2 }
 0x1ba   :  { %v410_v38 = vadd.f32 %v630_v28, %v409_v36 }
 0x1bc   :  { %v446_v39 = vmax.f32 %v410_v38, 0.0 }
 0x1be   :  { %462 = vxpose.xlu0.b32.cont [3/16] (narrow) %v446_v39, 8 }
 0x1c1   :  { %v411_v37 = vpop.f32.mrf.mxu2 }
 0x1c2   :  { %v412_v40 = vadd.f32 %v630_v28, %v411_v37 }
 0x1c4   :  { %v447_v41 = vmax.f32 %v412_v40, 0.0 }
 0x1c6   :  { %463 = vxpose.xlu0.b32.cont [4/16] (narrow) %v447_v41, 8 }
 0x1c9   :  { %v414_v42 = vpop.f32.mrf.mxu2 }
 0x1ca   :  { %v415_v43 = vadd.f32 %v630_v28, %v414_v42 }
 0x1cc   :  { %v448_v44 = vmax.f32 %v415_v43, 0.0 }
 0x1ce   :  { %464 = vxpose.xlu0.b32.cont [5/16] (narrow) %v448_v44, 8 }
 0x1d1   :  { %v416_v45 = vpop.f32.mrf.mxu2 }
 0x1d2   :  { %v417_v46 = vadd.f32 %v630_v28, %v416_v45 }
 0x1d4   :  { %v449_v35 = vmax.f32 %v417_v46, 0.0 }
 0x1d6   :  { %465 = vxpose.xlu0.b32.cont [6/16] (narrow) %v449_v35, 8 }
 0x1d9   :  { %v419_v47 = vpop.f32.mrf.mxu2 }
 0x1da   :  { %v420_v48 = vadd.f32 %v630_v28, %v419_v47 }
 0x1dc   :  { %v450_v49 = vmax.f32 %v420_v48, 0.0 }
 0x1de   :  { %466 = vxpose.xlu0.b32.cont [7/16] (narrow) %v450_v49, 8 }
 0x1e1   :  { %v421_v50 = vpop.f32.mrf.mxu2 }
 0x1e2   :  { %v422_v51 = vadd.f32 %v630_v28, %v421_v50 }
 0x1e4   :  { %v451_v52 = vmax.f32 %v422_v51, 0.0 }
 0x1e6   :  { %467 = vxpose.xlu0.b32.cont [8/16] (narrow) %v451_v52, 8 }
 0x1e9   :  { %v424_v53 = vpop.f32.mrf.mxu2 }
 0x1ea   :  { %v425_v54 = vadd.f32 %v630_v28, %v424_v53 }
 0x1ec   :  { %v452_v55 = vmax.f32 %v425_v54, 0.0 }
 0x1ee   :  { %468 = vxpose.xlu0.b32.cont [9/16] (narrow) %v452_v55, 8 }
 0x1f1   :  { %v426_v56 = vpop.f32.mrf.mxu2 }
 0x1f2   :  { %v427_v57 = vadd.f32 %v630_v28, %v426_v56 }
 0x1f4   :  { %v453_v58 = vmax.f32 %v427_v57, 0.0 }
 0x1f6   :  { %469 = vxpose.xlu0.b32.cont [10/16] (narrow) %v453_v58, 8 }
 0x1f9   :  { %v429_v59 = vpop.f32.mrf.mxu2 }
 0x1fa   :  { %v430_v60 = vadd.f32 %v630_v28, %v429_v59 }
 0x1fc   :  { %v454_v61 = vmax.f32 %v430_v60, 0.0 }
 0x1fe   :  { %470 = vxpose.xlu0.b32.cont [11/16] (narrow) %v454_v61, 8 }
 0x201   :  { %v431_v62 = vpop.f32.mrf.mxu2 }
 0x202   :  { %v432_v63 = vadd.f32 %v630_v28, %v431_v62 }
 0x204   :  { %v455_v0 = vmax.f32 %v432_v63, 0.0 }
 0x206   :  { %471 = vxpose.xlu0.b32.cont [12/16] (narrow) %v455_v0, 8 }
 0x20f   :  { %v434_v1 = vpop.f32.mrf.mxu3 }
 0x210   :  { %v435_v2 = vadd.f32 %v630_v28, %v434_v1 }
 0x212   :  { %v456_v3 = vmax.f32 %v435_v2, 0.0 }
 0x214   :  { %472 = vxpose.xlu0.b32.cont [13/16] (narrow) %v456_v3, 8 }
 0x217   :  { %v436_v4 = vpop.f32.mrf.mxu3 }
 0x218   :  { %v437_v5 = vadd.f32 %v630_v28, %v436_v4 }
 0x21a   :  { %v457_v6 = vmax.f32 %v437_v5, 0.0 }
 0x21c   :  { %473 = vxpose.xlu0.b32.cont [14/16] (narrow) %v457_v6, 8 }
 0x21f   :  { %v439_v7 = vpop.f32.mrf.mxu3 }
 0x220   :  { %v440_v8 = vadd.f32 %v630_v28, %v439_v7 }
 0x222   :  { %v458_v9 = vmax.f32 %v440_v8, 0.0 }
 0x224   :  { %474 = vxpose.xlu0.b32.cont [15/16] (narrow) %v458_v9, 8 }
 0x227   :  { %v441_v10 = vpop.f32.mrf.mxu3 }
 0x228   :  { %v442_v11 = vadd.f32 %v630_v28, %v441_v10 }
 0x22a   :  { %v459_v12 = vmax.f32 %v442_v11, 0.0 }
 0x22c   :  { %475 = vxpose.xlu0.b32.end [16/16] (narrow) %v459_v12, 8 }
 0x258   :  { %v476_v13 = vpop.trf.xlu0 }
 0x259   :  { %492 = vst [vmem:[#allocation5] sm:$0x3] %v476_v13 }
 0x25a   :  { %503 = dma.vmem_to_hbm [thread:$0]  %s499_s12, 32, %s501_s14, [#allocation4]  }
 0x25b   :  { %681 = dma.done.wait [#allocation4], 32  }
 0x25c   :  { %682 = vsyncadd [#allocation4], 4294967264 }
 0x25d   :  { %508 = vsyncpa [#allocation3], 1 }
 0x25e   :  { %509 = vsyncpa [#allocation4], 1 }

</bundles_post_ra>
